<compile_context>
chip_gen: v6e
topology: v6e:2x2x1
jax: 0.10.0
libtpu: 0.0.40
codegen_flags: <defaults>
</compile_context>

<pallas_src>
import math

import jax
import jax.numpy as jnp
from jax.experimental import pallas as pl
from jax.experimental.pallas import tpu as pltpu


def _round_up(x: int, m: int) -> int:
    return ((x + m - 1) // m) * m


def _fused_linear_kernel(x_ref, w_ref, b_ref, o_ref):
    # x_ref: [TB, D] f32    w_ref: [D, Op] bf16    b_ref: [1, Op] f32
    # o_ref: [TB, Op] f32
    x = x_ref[...].astype(jnp.bfloat16)            # in-kernel cast, hidden under DMA
    acc = jnp.dot(x, w_ref[...], preferred_element_type=jnp.float32)  # MXU, f32 acc
    o_ref[...] = acc + b_ref[...]                  # f32 epilogue, lane-dense store


def prepare_params(w1, b1, w2, b2):
    """One-time fuse + pad + transpose + cast of the PyTorch-layout params.

    w1: [H, D]  b1: [H]  w2: [O, H]  b2: [O]   (nn.Linear [out, in] layout)

    There is no nonlinearity between the Linears, so they fuse exactly:
        y = (x @ W1^T + b1) @ W2^T + b2 = x @ (W2 @ W1)^T + (W2 @ b1 + b2)
    (bf16 rounding of the fused weight differs slightly from rounding W1/W2
     separately; the reference checks in __main__ account for this.)
    """
    H, D = w1.shape
    O = w2.shape[0]
    Op = _round_up(O, 128)                         # lane-dense output width

    w1f, b1f = w1.astype(jnp.float32), b1.astype(jnp.float32)
    w2f, b2f = w2.astype(jnp.float32), b2.astype(jnp.float32)
    w_fused = w2f @ w1f                            # [O, D]
    b_fused = w2f @ b1f + b2f                      # [O]

    w_t = jnp.zeros((D, Op), jnp.bfloat16).at[:, :O].set(
        w_fused.T.astype(jnp.bfloat16))            # [D, Op] bf16, VMEM-resident
    b_p = jnp.zeros((1, Op), jnp.float32).at[0, :O].set(b_fused)

    return dict(w_t=w_t, b=b_p, in_features=D, out_features=O)


def fashion_mnist_model_v0(x_nchw, params, *, max_batch_tile=1024):
    """Forward pass of FashionMNISTModelV0 with pre-prepared (fused) params.

    x_nchw : [B, C, H, W] float32 (PyTorch NCHW)
    params : output of prepare_params(w1, b1, w2, b2)
    returns: [B, out_features] float32 logits
    """
    B = x_nchw.shape[0]
    D = math.prod(x_nchw.shape[1:])                # nn.Flatten(), static
    assert D == params["in_features"]
    O = params["out_features"]

    w_t, b_p = params["w_t"], params["b"]
    Op = w_t.shape[1]

    # Free, contiguous reshape of NCHW -> [B, D]; no pad, no cast in the wrapper.
    x_flat = x_nchw.reshape(B, D)

    # Batch tiling: >= 2 grid steps when B >= 16 (keeps both v7x TCs busy),
    # TB a multiple of 8 sublanes, capped so double-buffered f32 tiles respect
    # v5e's 16 MiB / v7x's 32 MiB scoped-VMEM defaults.  The last tile may be
    # ragged: garbage rows only flow into output rows that get sliced off.
    n_tiles = pl.cdiv(B, max_batch_tile)
    if B >= 16:
        n_tiles = max(n_tiles, 2)
    TB = _round_up(pl.cdiv(B, n_tiles), 8)
    grid_n = pl.cdiv(B, TB)
    Bp = grid_n * TB                               # padded rows in the output only

    flops = 2 * Bp * D * Op
    bytes_accessed = B * D * 4 + w_t.size * 2 + b_p.size * 4 + Bp * Op * 4

    out = pl.pallas_call(
        _fused_linear_kernel,
        out_shape=jax.ShapeDtypeStruct((Bp, Op), jnp.float32),
        grid_spec=pltpu.PrefetchScalarGridSpec(
            num_scalar_prefetch=0,
            grid=(grid_n,),
            in_specs=[
                pl.BlockSpec((TB, D), lambda i: (i, 0)),   # raw f32 x, streamed per tile
                pl.BlockSpec((D, Op), lambda i: (0, 0)),   # fused weight, VMEM-resident
                pl.BlockSpec((1, Op), lambda i: (0, 0)),   # fused bias, VMEM-resident
            ],
            out_specs=pl.BlockSpec((TB, Op), lambda i: (i, 0)),
        ),
        compiler_params=pltpu.CompilerParams(
            dimension_semantics=("parallel",),             # batch tiles -> both TCs on v7x
        ),
        cost_estimate=pl.CostEstimate(
            flops=flops, transcendentals=0, bytes_accessed=bytes_accessed),
    )(x_flat, w_t, b_p)

    return out[:B, :O]                                     # drop batch / lane padding


if __name__ == "__main__":
    # FashionMNIST-like shapes: batch=2, 1 channel, 28x28 image.
    B, C, Himg, Wimg = 2, 1, 28, 28
    input_shape = C * Himg * Wimg          # 784
    hidden_units = 32
    output_shape = 10

    key = jax.random.PRNGKey(0)
    kx, kw1, kb1, kw2, kb2 = jax.random.split(key, 5)

    x = jax.random.normal(kx, (B, C, Himg, Wimg), dtype=jnp.float32)

    # PyTorch nn.Linear weight layout: [out_features, in_features].
    w1 = jax.random.normal(kw1, (hidden_units, input_shape), dtype=jnp.float32) * 0.02
    b1 = jax.random.normal(kb1, (hidden_units,), dtype=jnp.float32) * 0.02
    w2 = jax.random.normal(kw2, (output_shape, hidden_units), dtype=jnp.float32) * 0.02
    b2 = jax.random.normal(kb2, (output_shape,), dtype=jnp.float32) * 0.02

    params = prepare_params(w1, b1, w2, b2)                 # one-time fused weight prep
    logits = fashion_mnist_model_v0(x, params)
    jax.block_until_ready(logits)
    assert logits.shape == (B, output_shape)

    # Reference 1: mirror the kernel's math exactly (bf16 x, bf16 fused W, f32 acc).
    xb = x.reshape(B, -1).astype(jnp.bfloat16).astype(jnp.float32)
    wb = params["w_t"].astype(jnp.float32)[:, :output_shape]
    ref_fused = jnp.dot(xb, wb, precision=jax.lax.Precision.HIGHEST) \
        + params["b"][0, :output_shape]
    assert jnp.allclose(logits, ref_fused, atol=2e-3, rtol=2e-2)

    # Reference 2: full-f32 PyTorch-equivalent math (loose tol for bf16 rounding
    # and the fused-Linear accumulation-order change).
    ref_f32 = (x.reshape(B, -1) @ w1.T + b1) @ w2.T + b2
    assert jnp.allclose(logits, ref_f32, atol=5e-2, rtol=5e-2)

    print("KERNEL_OK")
</pallas_src>

<mosaic_0001>
module attributes {stable_mosaic.version = 11 : i64} {
  func.func @_fused_linear_kernel(%arg0: i32, %arg1: memref<8x784xf32, #tpu.memory_space<vmem>>, %arg2: memref<784x128xbf16, #tpu.memory_space<vmem>>, %arg3: memref<1x128xf32, #tpu.memory_space<vmem>>, %arg4: memref<8x128xf32, #tpu.memory_space<vmem>>) attributes {dimension_semantics = [#tpu.dimension_semantics<parallel>], iteration_bounds = array<i64: 1>, scalar_prefetch = 0 : i64, scratch_operands = 0 : i64, tpu.core_type = #tpu.core_type<tc>, window_params = [{transform_indices = @transform_0, window_bounds = array<i64: 8, 784>}, {pipeline_mode = #tpu.pipeline_mode<synchronous>, transform_indices = @transform_1, window_bounds = array<i64: 784, 128>}, {pipeline_mode = #tpu.pipeline_mode<synchronous>, transform_indices = @transform_2, window_bounds = array<i64: 1, 128>}, {transform_indices = @transform_3, window_bounds = array<i64: 8, 128>}]} {
    %c0 = arith.constant 0 : index
    %c0_0 = arith.constant 0 : index
    %0 = vector.load %arg1[%c0, %c0_0] : memref<8x784xf32, #tpu.memory_space<vmem>>, vector<8x784xf32>
    %1 = arith.truncf %0 : vector<8x784xf32> to vector<8x784xbf16>
    %c0_1 = arith.constant 0 : index
    %c0_2 = arith.constant 0 : index
    %2 = vector.load %arg2[%c0_1, %c0_2] : memref<784x128xbf16, #tpu.memory_space<vmem>>, vector<784x128xbf16>
    %cst = arith.constant dense<0.000000e+00> : vector<8x128xf32>
    %3 = tpu.matmul %1, %2, %cst {dimension_numbers = #tpu.dot_dimension_numbers<[1], [0], [0], [1], [0, 0, 1, 1], [], []>} : vector<8x784xbf16>, vector<784x128xbf16>, vector<8x128xf32> -> vector<8x128xf32>
    %c0_3 = arith.constant 0 : index
    %c0_4 = arith.constant 0 : index
    %4 = vector.load %arg3[%c0_3, %c0_4] : memref<1x128xf32, #tpu.memory_space<vmem>>, vector<1x128xf32>
    %5 = vector.broadcast %4 : vector<1x128xf32> to vector<8x128xf32>
    %6 = arith.addf %3, %5 : vector<8x128xf32>
    %c0_5 = arith.constant 0 : index
    %c0_6 = arith.constant 0 : index
    %7 = vector.load %arg4[%c0_5, %c0_6] : memref<8x128xf32, #tpu.memory_space<vmem>>, vector<8x128xf32>
    tpu.vector_store %arg4[%c0_5, %c0_6], %6 {strides = array<i32>} : memref<8x128xf32, #tpu.memory_space<vmem>>, vector<8x128xf32>,
    return
  }
  func.func @transform_0(%arg0: i32) -> (i32, i32) {
    %c0_i32 = arith.constant 0 : i32
    %c0_i32_0 = arith.constant 0 : i32
    return %arg0, %c0_i32 : i32, i32
  }
  func.func @transform_1(%arg0: i32) -> (i32, i32) {
    %c0_i32 = arith.constant 0 : i32
    %c0_i32_0 = arith.constant 0 : i32
    %c0_i32_1 = arith.constant 0 : i32
    return %c0_i32, %c0_i32_0 : i32, i32
  }
  func.func @transform_2(%arg0: i32) -> (i32, i32) {
    %c0_i32 = arith.constant 0 : i32
    %c0_i32_0 = arith.constant 0 : i32
    %c0_i32_1 = arith.constant 0 : i32
    return %c0_i32, %c0_i32_0 : i32, i32
  }
  func.func @transform_3(%arg0: i32) -> (i32, i32) {
    %c0_i32 = arith.constant 0 : i32
    %c0_i32_0 = arith.constant 0 : i32
    return %arg0, %c0_i32 : i32, i32
  }
}

</mosaic_0001>

<bundles_post_ra>
// kernel: tpu_custom_call.1
= control target key start
LH: loop header
LB: loop body
LE: loop exit
PB: predicated region body
PF: predicated region fallthrough
CT: control target
= control target key end

     0   :  { %8 = vsyncpa [#allocation3], 0  ;;  %s1029_s0 = inlined_call_operand.hbm [shape: f32[2,784], index: 0, kind: input, shape index: {}]   ;;  %s1030_s1 = inlined_call_operand.hbm [shape: bf16[784,128], index: 1, kind: input, shape index: {}]   ;;  %s1031_s2 = inlined_call_operand.vmem [shape: f32[1,128], index: 2, kind: input, shape index: {}]   ;;  %s1032_s3 = inlined_call_operand.hbm [shape: f32[8,128], index: 3, kind: output, shape index: {}]  }
   0x1   :  { %9 = vsyncpa [#allocation6], 0 }
   0x2   :  { %10 = vsyncpa [#allocation4], 0 }
   0x3   :  { %15 = vsyncadd [#allocation3], 672  ;;  %s987_s12 = smov [#allocation2]  }
   0x4   :  { %s16_s13 = sshll.u32 %s987_s12, 4  ;;  %s17_s13 = int_to_ptr.vmem [resolvable:$true] %s16_s13 }
   0x5   :  { %s929_s14 = scalar_lea.vmem %s17_s13, 224  ;;  %s933_s15 = scalar_lea.vmem %s17_s13, 896 }
   0x6   :  { %p930_p0 = scmp.ne.s32.totalorder %s17_s13, %s929_s14  ;;  %p934_p1 = scmp.lt.s32.totalorder %s17_s13, %s17_s13 }
   0x7   :  { %p935_p2 = scmp.lt.s32.totalorder %s933_s15, %s929_s14 }
   0x9   :  { %p936_p3 = por %p935_p2, %p934_p1 }
   0xb   :  { %p937_p4 = pnand %p936_p3, %p930_p0 }
   0xd   :  { %940 = shalt.err (!%p937_p4)
}
   0xe   :  { %s988_s16 = smov 224   ;;  %s989_s17 = smov 14  }
   0xf   :  { %22 = dma.hbm_to_vmem [thread:$0]  %s1029_s0, 224, %s17_s13, [#allocation3], %s988_s16, %s988_s16, %s989_s17  }
  0x10   :  { %s990_s20 = smov [#allocation5]  }
  0x11   :  { %s28_s21 = sshll.u32 %s990_s20, 4  ;;  %s29_s21 = int_to_ptr.vmem [resolvable:$true] %s28_s21 }
  0x12   :  { %s949_s22 = scalar_lea.vmem %s29_s21, 6272  ;;  %p954_p6 = scmp.lt.s32.totalorder %s29_s21, %s29_s21 }
  0x13   :  { %p950_p5 = scmp.ne.s32.totalorder %s29_s21, %s949_s22  ;;  %p955_p7 = scmp.lt.s32.totalorder %s949_s22, %s949_s22 }
  0x15   :  { %p956_p8 = por %p955_p7, %p954_p6 }
  0x17   :  { %p957_p9 = pnand %p956_p8, %p950_p5 }
  0x19   :  { %960 = shalt.err (!%p957_p9)
}
  0x1a   :  { %s991_s23 = smov 64   ;;  %s992_s24 = smov 4  }
  0x1b   :  { %34 = dma.hbm_to_vmem [thread:$0]  %s1030_s1, 6272, %s29_s21, [#allocation6], %s991_s23, %s991_s23, %s992_s24  }
  0x1c   :  { %981 = dma.done.wait [#allocation3], 896  }
  0x1d   :  { %982 = vsyncadd [#allocation3], 4294966400 }
  0x1e   :  { %983 = dma.done.wait [#allocation6], 6272  }
  0x1f   :  { %984 = vsyncadd [#allocation6], 4294961024  ;;  %v860_v0 = vld [vmem:[#allocation5 + $0x78] sm:$0xff]   ;;  %v864_v4 = vld [vmem:[#allocation5 + $0x70] sm:$0xff]   ;;  %v993_v23 = vmov 1983009808   ;;  %v67_v25 = vlaneseq }
  0x20   :  { %v861_v1 = vld [vmem:[#allocation5 + $0x38] sm:$0xff]   ;;  %776 = vmatprep.subr.bf16.mxu0 %v860_v0  ;;  %v865_v5 = vld [vmem:[#allocation5 + $0x30] sm:$0xff]   ;;  %v868_v8 = vld [vmem:[#allocation5 + $0x68] sm:$0xff]   ;;  %v65_v24 = vunpack.c.l.s4 %v993_v23  ;;  %v994_v47 = vmov 0.0   ;;  %vm995_vm0 = vmmov 0   ;;  %vm544_vm1 = vcmask 130048  }
  0x21   :  { %v862_v2 = vld [vmem:[#allocation5 + $0xf8] sm:$0xff]   ;;  %777 = vmatpush3.bf16.msra.mxu0 %v861_v1  ;;  %v866_v6 = vld [vmem:[#allocation5 + $0xf0] sm:$0xff]   ;;  %v869_v9 = vld [vmem:[#allocation5 + $0x28] sm:$0xff]   ;;  %v68_v31 = vshrl.u32 %v67_v25, 7  ;;  %s996_s27 = smov [#allocation7]  }
  0x22   :  { %v863_v3 = vld [vmem:[#allocation5 + $0xb8] sm:$0xff]   ;;  %798 = vmatprep.subr.bf16.mxu1 %v862_v2  ;;  %778 = vmatprep.subr.bf16.mxu0 %v864_v4  ;;  %v867_v7 = vld [vmem:[#allocation5 + $0xb0] sm:$0xff]   ;;  %v870_v10 = vld [vmem:[#allocation5 + $0xe8] sm:$0xff]   ;;  %v66_v30 = vunpack.c.0.s8 %v65_v24  ;;  %s715_s28 = sshll.u32 %s996_s27, 4  ;;  %s716_s28 = int_to_ptr.vmem [resolvable:$true] %s715_s28 }
  0x23   :  { %799 = vmatpush3.bf16.msra.mxu1 %v863_v3  ;;  %v871_v11 = vld [vmem:[#allocation5 + $0xa8] sm:$0xff]   ;;  %v872_v12 = vld [vmem:[#allocation5 + $0x60] sm:$0xff]   ;;  %v876_v16 = vld [vmem:[#allocation5 + $0x58] sm:$0xff]   ;;  %s961_s29 = scalar_lea.vmem %s716_s28, 128  ;;  %p966_p11 = scmp.lt.s32.totalorder %s716_s28, %s716_s28 }
  0x24   :  { %800 = vmatprep.subr.bf16.mxu1 %v866_v6  ;;  %v873_v13 = vld [vmem:[#allocation5 + $0x20] sm:$0xff]   ;;  %v877_v17 = vld [vmem:[#allocation5 + $0x18] sm:$0xff]   ;;  %v880_v20 = vld [vmem:[#allocation5 + $0x50] sm:$0xff]   ;;  %v69_v36 = vsub.s32 %v66_v30, %v68_v31  ;;  %p962_p10 = scmp.ne.s32.totalorder %s716_s28, %s961_s29  ;;  %p967_p12 = scmp.lt.s32.totalorder %s961_s29, %s961_s29 }
  0x25   :  { %779 = vmatpush3.bf16.msra.mxu0 %v865_v5  ;;  %v874_v14 = vld [vmem:[#allocation5 + $0xe0] sm:$0xff]   ;;  %v878_v18 = vld [vmem:[#allocation5 + $0xd8] sm:$0xff]   ;;  %v881_v21 = vld [vmem:[#allocation5 + $0x10] sm:$0xff]  }
  0x26   :  { %780 = vmatprep.subr.bf16.mxu0 %v868_v8  ;;  %v875_v15 = vld [vmem:[#allocation5 + $0xa0] sm:$0xff]   ;;  %v879_v19 = vld [vmem:[#allocation5 + $0x98] sm:$0xff]   ;;  %v882_v22 = vld [vmem:[#allocation5 + $0xd0] sm:$0xff]   ;;  %p968_p13 = por %p967_p12, %p966_p11 }
  0x27   :  { %801 = vmatpush3.bf16.msra.mxu1 %v867_v7  ;;  %v883_v26 = vld [vmem:[#allocation5 + $0x90] sm:$0xff]   ;;  %v884_v27 = vld [vmem:[#allocation5 + $0x48] sm:$0xff]   ;;  %v888_v33 = vld [vmem:[#allocation5 + $0x40] sm:$0xff]  }
  0x28   :  { %802 = vmatprep.subr.bf16.mxu1 %v870_v10  ;;  %v885_v28 = vld [vmem:[#allocation5 + $0x8] sm:$0xff]   ;;  %v889_v34 = vld [vmem:[#allocation5] sm:$0xff]   ;;  %v896_v42 = vld [vmem:[#allocation5 + $0x178] sm:$0xff]   ;;  %p969_p0 = pnand %p968_p13, %p962_p10 }
  0x29   :  { %781 = vmatpush3.bf16.msra.mxu0 %v869_v9  ;;  %v886_v29 = vld [vmem:[#allocation5 + $0xc8] sm:$0xff]   ;;  %v890_v35 = vld [vmem:[#allocation5 + $0xc0] sm:$0xff]   ;;  %v899_v52 = vld [vmem:[#allocation5 + $0x138] sm:$0xff]  }
  0x2a   :  { %782 = vmatprep.subr.bf16.mxu0 %v872_v12  ;;  %v887_v32 = vld [vmem:[#allocation5 + $0x88] sm:$0xff]   ;;  %v893_v38 = vld [vmem:[#allocation2 + $0x1c] ss:$14 sps:$4 sm:$0xff]   ;;  %v906_v0 = vld [vmem:[#allocation5 + $0x158] sm:$0xff]  }
  0x2b   :  { %803 = vmatpush3.bf16.msra.mxu1 %v871_v11  ;;  %v891_v37 = vld [vmem:[#allocation2] ss:$14 sps:$4 sm:$0xff]   ;;  %v895_v39 = vld [vmem:[#allocation5 + $0x80] sm:$0xff]   ;;  %v84_v41 = vrot.slane %v893_v38, %v69_v36  ;;  %v897_v43 = vld [vmem:[#allocation2 + $0x4] ss:$14 sps:$4 sm:$0xff]  }
  0x2c   :  { %804 = vmatprep.subr.bf16.mxu1 %v874_v14  ;;  %v70_v40 = vrot.slane %v891_v37, %v69_v36  ;;  %v898_v44 = vld [vmem:[#allocation2 + $0x20] ss:$14 sps:$4 sm:$0xff]   ;;  %v77_v48 = vrot.slane %v897_v43, %v69_v36  ;;  %v904_v61 = vld [vmem:[#allocation5 + $0x160] sm:$0xff]   ;;  %v917_v2 = vld [vmem:[#allocation2 + $0x28] ss:$14 sps:$4 sm:$0x33]  }
  0x2d   :  { %783 = vmatpush3.bf16.msra.mxu0 %v873_v13  ;;  %v91_v49 = vrot.slane %v898_v44, %v69_v36  ;;  %v900_v55 = vld [vmem:[#allocation5 + $0x170] sm:$0xff]   ;;  %v902_v59 = vld [vmem:[#allocation5 + $0x168] sm:$0xff]   ;;  %v912_v62 = vld [vmem:[#allocation5 + $0x180] sm:$0xff]   ;;  %v127_v8 = vrot.slane %v917_v2, %v69_v36 }
  0x2e   :  { %784 = vmatprep.subr.bf16.mxu0 %v876_v16  ;;  %v93_v45 = vcombine.high %v70_v40, %v84_v41  ;;  %v92_v46 = vcombine.low %v70_v40, %v84_v41  ;;  %v901_v58 = vld [vmem:[#allocation5 + $0x130] sm:$0xff]   ;;  %v903_v60 = vld [vmem:[#allocation5 + $0x128] sm:$0xff]   ;;  %v905_v63 = vld [vmem:[#allocation5 + $0x120] sm:$0xff]  }
  0x2f   :  { %805 = vmatpush3.bf16.msra.mxu1 %v875_v15  ;;  %v95_v53 = vcombine.high %v77_v48, %v91_v49  ;;  %v94_v54 = vcombine.low %v77_v48, %v91_v49  ;;  %v915_v1 = vld [vmem:[#allocation2 + $0xc] ss:$14 sps:$4 sm:$0x33]   ;;  %v907_v3 = vld [vmem:[#allocation5 + $0x118] sm:$0xff]   ;;  %v910_v14 = vld [vmem:[#allocation5 + $0x148] sm:$0xff]  }
  0x30   :  { %806 = vmatprep.subr.bf16.mxu1 %v878_v18  ;;  %v139_v50 = vpack.c.bf16 %v93_v45, %v93_v45  ;;  %v138_v51 = vpack.c.bf16 %v92_v46, %v92_v46  ;;  %v919_v4 = vld [vmem:[#allocation2 + $0x8] ss:$14 sps:$4 sm:$0xff]   ;;  %v920_v5 = vld [vmem:[#allocation2 + $0x24] ss:$14 sps:$4 sm:$0xff]   ;;  %v113_v7 = vrot.slane %v915_v1, %v69_v36 }
  0x31   :  { %785 = vmatpush3.bf16.msra.mxu0 %v877_v17  ;;  %v141_v56 = vpack.c.bf16 %v95_v53, %v95_v53  ;;  %v140_v57 = vpack.c.bf16 %v94_v54, %v94_v54  ;;  %v908_v6 = vld [vmem:[#allocation5 + $0x150] sm:$0xff]   ;;  %v106_v9 = vrot.slane %v919_v4, %v69_v36  ;;  %v120_v10 = vrot.slane %v920_v5, %v69_v36  ;;  %v911_v17 = vld [vmem:[#allocation5 + $0x108] sm:$0xff]   ;;  %v913_v18 = vld [vmem:[#allocation5 + $0x140] sm:$0xff]  }
  0x32   :  { %786 = vmatprep.subr.bf16.mxu0 %v880_v20  ;;  %580 = vmatprep.mubr.bf16.mxu0 %v139_v50  ;;  %v130_v11 = vcombine.low %v113_v7, %v127_v8  ;;  %v909_v12 = vld [vmem:[#allocation5 + $0x110] sm:$0xff]   ;;  %v914_v20 = vld [vmem:[#allocation5 + $0x100] sm:$0xff]  }
  0x33   :  { %807 = vmatpush3.bf16.msra.mxu1 %v879_v19  ;;  %620 = vmatprep.mubr.bf16.mxu1 %v141_v56  ;;  %v129_v13 = vcombine.high %v106_v9, %v120_v10  ;;  %v128_v19 = vcombine.low %v106_v9, %v120_v10 }
  0x34   :  { %808 = vmatprep.subr.bf16.mxu1 %v882_v22  ;;  %v144_v15 = vpack.c.bf16 %v130_v11, %v130_v11 }
  0x35   :  { %787 = vmatpush3.bf16.msra.mxu0 %v881_v21  ;;  %v143_v16 = vpack.c.bf16 %v129_v13, %v129_v13  ;;  %v142_v21 = vpack.c.bf16 %v128_v19, %v128_v19 }
  0x36   :  { %788 = vmatprep.subr.bf16.mxu0 %v884_v27 }
  0x37   :  { %809 = vmatpush3.bf16.msra.mxu1 %v883_v26 }
  0x38   :  { %810 = vmatprep.subr.bf16.mxu1 %v886_v29 }
  0x39   :  { %789 = vmatpush3.bf16.msra.mxu0 %v885_v28 }
  0x3a   :  { %790 = vmatprep.subr.bf16.mxu0 %v888_v33 }
  0x3b   :  { %811 = vmatpush3.bf16.msra.mxu1 %v887_v32 }
  0x3c   :  { %812 = vmatprep.subr.bf16.mxu1 %v890_v35  ;;  %v725_v35 = vld [vmem:[%s1031_s2] ss:$0 sm:$0xff] }
  0x3d   :  { %791 = vmatpush3.bf16.msra.mxu0 %v889_v34 }
  0x3e   :  { %820 = vmatprep.subr.bf16.mxu0 %v896_v42 }
  0x3f   :  { %813 = vmatpush3.bf16.msra.mxu1 %v895_v39 }
  0x40   :  { %844 = vmatprep.subr.bf16.mxu1 %v994_v47  ;;  %581 = vmatmul.mubr.bf16.vlgmr.msra.gmra.mxu0 %v138_v51 }
  0x41   :  { %821 = vmatpush3.bf16.msra.mxu0 %v899_v52  ;;  %660 = vmatprep.mubr.bf16.mxu0 %v143_v16 }
  0x42   :  { %822 = vmatprep.subr.bf16.mxu0 %v900_v55  ;;  %621 = vmatmul.mubr.bf16.vlgmr.msra.gmra.mxu1 %v140_v57 }
  0x43   :  { %846 = vmatprep.mubr.msk.bf16.mxu1 %vm995_vm0, %v994_v47  ;;  %845 = vmatpush3.bf16.msra.mxu1 %v912_v62 }
  0x45   :  { %823 = vmatpush3.bf16.msra.mxu0 %v901_v58 }
  0x46   :  { %824 = vmatprep.subr.bf16.mxu0 %v902_v59 }
  0x49   :  { %825 = vmatpush3.bf16.msra.mxu0 %v903_v60 }
  0x4a   :  { %826 = vmatprep.subr.bf16.mxu0 %v904_v61  ;;  %847 = vmatmul.mubr.msk.bf16.vlgmr.msra.gmra.mxu1 %vm544_vm1, %v144_v15 }
  0x4d   :  { %827 = vmatpush3.bf16.msra.mxu0 %v905_v63 }
  0x4e   :  { %828 = vmatprep.subr.bf16.mxu0 %v906_v0 }
  0x51   :  { %829 = vmatpush3.bf16.msra.mxu0 %v907_v3 }
  0x52   :  { %830 = vmatprep.subr.bf16.mxu0 %v908_v6 }
  0x55   :  { %831 = vmatpush3.bf16.msra.mxu0 %v909_v12 }
  0x56   :  { %832 = vmatprep.subr.bf16.mxu0 %v910_v14 }
  0x59   :  { %833 = vmatpush3.bf16.msra.mxu0 %v911_v17 }
  0x5a   :  { %834 = vmatprep.subr.bf16.mxu0 %v913_v18 }
  0x5d   :  { %835 = vmatpush3.bf16.msra.mxu0 %v914_v20 }
  0x60   :  { %661 = vmatmul.mubr.bf16.vlgmr.msra.gmra.mxu0 %v142_v21 }
 0x100   :  { %v792_v22 = vpop.f32.mrf.mxu0 }
 0x102   :  { %v793_v23 = vpop.f32.mrf.mxu0  ;;  %v814_v24 = vpop.f32.mrf.mxu1 }
 0x103   :  { %v794_v34 = vadd.f32 %v793_v23, %v792_v22 }
 0x104   :  { %v795_v25 = vpop.f32.mrf.mxu0  ;;  %v815_v26 = vpop.f32.mrf.mxu1 }
 0x105   :  { %v583_v36 = vadd.f32 %v794_v34, %v725_v35  ;;  %v816_v37 = vadd.f32 %v815_v26, %v814_v24 }
 0x106   :  { %v796_v27 = vpop.f32.mrf.mxu0  ;;  %v817_v28 = vpop.f32.mrf.mxu1 }
 0x107   :  { %v623_v40 = vadd.f32 %v816_v37, %v583_v36 }
 0x108   :  { %v818_v29 = vpop.f32.mrf.mxu1 }
 0x10a   :  { %v702_v30 = vpop.f32.mrf.mxu1 }
 0x10c   :  { %v848_v31 = vpop.f32.mrf.mxu1 }
 0x10e   :  { %v705_v32 = vpop.f32.mrf.mxu1 }
 0x110   :  { %v849_v33 = vpop.f32.mrf.mxu1 }
 0x120   :  { %v836_v38 = vpop.f32.mrf.mxu0 }
 0x122   :  { %v837_v39 = vpop.f32.mrf.mxu0 }
 0x123   :  { %v838_v41 = vadd.f32 %v837_v39, %v836_v38 }
 0x124   :  { %v839_v42 = vpop.f32.mrf.mxu0 }
 0x125   :  { %v663_v43 = vadd.f32 %v838_v41, %v623_v40 }
 0x126   :  { %v840_v44 = vpop.f32.mrf.mxu0 }
 0x127   :  { %v703_v45 = vadd.f32 %v702_v30, %v663_v43 }
 0x129   :  { %708 = vst [vmem:[#allocation7] sm:$0xff] %v703_v45 }
 0x12a   :  { %972 = shalt.err (!%p969_p0)
}
 0x12b   :  { %718 = dma.vmem_to_hbm [thread:$0]  %s716_s28, 128, %s1032_s3, [#allocation4]  }
 0x12c   :  { %985 = dma.done.wait [#allocation4], 128  }
 0x12d   :  { %986 = vsyncadd [#allocation4], 4294967168 }
 0x12e   :  { %722 = vsyncpa [#allocation3], 1 }
 0x12f   :  { %723 = vsyncpa [#allocation6], 1 }
 0x130   :  { %724 = vsyncpa [#allocation4], 1 }

</bundles_post_ra>
